<compile_context>
chip_gen: v7x
topology: tpu7x:2x2x1
jax: 0.10.0
libtpu: 0.0.40
codegen_flags: <defaults>
</compile_context>

<pallas_src>
import jax
import jax.numpy as jnp
import numpy as np
from jax.experimental import pallas as pl
from jax.experimental.pallas import tpu as pltpu


_MIN_BYTES_FOR_TC_SPLIT = 1 << 20    # force >= 2 grid blocks above this per-view size (v7x 2 TCs)
_MAX_LANE_TILE = 8192                # sanity cap on the lane (last-dim) tile width


def _weighted_mean_kernel(w_ref, *refs):
    """w_ref: SMEM (n_views,) f32 normalized weights; refs = (x_0..x_{V-1}, out)."""
    n_views = len(refs) - 1
    o_ref = refs[-1]
    acc = refs[0][...].astype(jnp.float32) * w_ref[0]
    for v in range(1, n_views):
        acc = acc + refs[v][...].astype(jnp.float32) * w_ref[v]
    o_ref[...] = acc.astype(o_ref.dtype)


def _chip_budgets(tile_budget_bytes, vmem_limit_bytes):
    """Chip-aware VMEM budgets: v7x has 64 MiB/TC, v5e/v6e have 128 MiB."""
    try:
        vmem_cap = int(getattr(pltpu.get_tpu_info(), "vmem_capacity_bytes"))
    except Exception:
        vmem_cap = 64 * 1024 * 1024           # conservative: assume v7x-sized VMEM
    big_vmem = vmem_cap >= 128 * 1024 * 1024
    limit = vmem_limit_bytes if vmem_limit_bytes is not None else (96 if big_vmem else 48) * 1024 * 1024
    limit = min(int(limit), (vmem_cap * 3) // 4)              # always leave on-chip headroom
    budget = tile_budget_bytes if tile_budget_bytes is not None else (32 if big_vmem else 24) * 1024 * 1024
    budget = max(64 * 1024, min(int(budget), limit // 2))     # double-buffered tiles stay under the limit
    return budget, limit


def _choose_layout(shape, itemsize, streams, tile_budget, sublane):
    """Pick a lane-dense 2-D layout (rows, cols) for this purely elementwise fusion."""
    n = int(np.prod(shape)) if len(shape) else 1
    rows0 = int(np.prod(shape[:-1])) if len(shape) >= 2 else 1
    cols0 = int(shape[-1]) if len(shape) >= 1 else 1
    if cols0 >= 128 and cols0 % 128 == 0:
        return rows0, cols0                    # already lane-dense
    if n % 128 == 0:
        # Order-preserving flatten to a wide lane-dense slab (free layout plumbing).
        lane_cap = tile_budget // (streams * 2 * itemsize * sublane)
        lane_cap = max(128, min(_MAX_LANE_TILE, (lane_cap // 128) * 128))
        best_any, best_tall = None, None
        for k in range(lane_cap // 128, 0, -1):
            lanes = 128 * k
            if n % lanes:
                continue
            if best_any is None:
                best_any = lanes
            if n // lanes >= sublane:          # keep >= 8 sublanes per tile when possible
                best_tall = lanes
                break
        lanes = best_tall or best_any or 128
        return n // lanes, lanes
    # Awkward total size: keep the collapsed 2-D shape; cdiv tiling masks the remainder.
    return rows0, cols0


def _choose_tiles(bv, dv, itemsize, streams, tile_budget, sublane):
    per_elem = streams * itemsize * 2          # all streams, double buffered
    # Feature (lane) tile: full width (one contiguous HBM slab per view) if it fits
    # with the minimum sublane row count; otherwise the widest 128-multiple that does.
    if dv * sublane * per_elem <= tile_budget:
        td = dv
    else:
        td = max(128, ((tile_budget // (sublane * per_elem)) // 128) * 128)
        td = min(td, dv)
    # Batch (sublane) tile from what is left of the budget.
    tb_cap = tile_budget // (per_elem * max(td, 1))
    tb = max(sublane, (tb_cap // sublane) * sublane)
    if tb >= bv:
        tb = bv                                # full-extent block is always legal
    return tb, td


def weighted_mean(inputs, weights, *, tile_budget_bytes=None, vmem_limit_bytes=None):
    """Pallas implementation of WeightedMean.forward.

    inputs : list of n_views arrays, all the same shape/dtype.
    weights: (n_views,) raw fusion weights (softmax applied here, as in the module).
    """
    n_views = len(inputs)
    shape = inputs[0].shape
    dtype = inputs[0].dtype
    for x in inputs:
        assert x.shape == shape and x.dtype == dtype, "all views must match"
    assert weights.shape == (n_views,)

    # Softmax over the tiny weight vector: one cheap XLA op, hoisted out of the kernel.
    w = jax.nn.softmax(weights.astype(jnp.float32), axis=0)

    itemsize = jnp.dtype(dtype).itemsize
    sublane = max(1, 8 * 4 // itemsize)        # 8 rows for f32, 16 for bf16
    streams = n_views + 1
    tile_budget, vmem_limit = _chip_budgets(tile_budget_bytes, vmem_limit_bytes)

    # Lane-dense 2-D layout + budget-derived tiles + cdiv grid (masked remainders).
    bv, dv = _choose_layout(shape, itemsize, streams, tile_budget, sublane)
    tb, td = _choose_tiles(bv, dv, itemsize, streams, tile_budget, sublane)
    grid_b = pl.cdiv(bv, tb)
    grid_d = pl.cdiv(dv, td)

    # v7x has 2 TensorCores; make sure both get parallel blocks on non-trivial inputs.
    if grid_b * grid_d == 1 and bv * dv * itemsize >= _MIN_BYTES_FOR_TC_SPLIT:
        if bv > sublane:
            half = (bv + 1) // 2
            tb = ((half + sublane - 1) // sublane) * sublane
            grid_b = pl.cdiv(bv, tb)
        elif dv > 128:
            half = (dv + 1) // 2
            td = ((half + 127) // 128) * 128
            grid_d = pl.cdiv(dv, td)

    views = [x.reshape(bv, dv) for x in inputs]
    view_spec = pl.BlockSpec((tb, td), lambda i, j: (i, j))

    out2d = pl.pallas_call(
        _weighted_mean_kernel,
        out_shape=jax.ShapeDtypeStruct((bv, dv), dtype),
        grid=(grid_b, grid_d),
        in_specs=[pl.BlockSpec(memory_space=pltpu.MemorySpace.SMEM)] + [view_spec] * n_views,
        out_specs=pl.BlockSpec((tb, td), lambda i, j: (i, j)),
        compiler_params=pltpu.CompilerParams(
            dimension_semantics=("parallel", "parallel"),
            vmem_limit_bytes=vmem_limit,
        ),
    )(w, *views)
    return out2d.reshape(shape)


if __name__ == "__main__":
    key = jax.random.PRNGKey(0)

    def ref_fn(inputs, weights):
        w_sm = jax.nn.softmax(weights.astype(jnp.float32), axis=0)
        stacked = jnp.stack([x.astype(jnp.float32) for x in inputs], axis=-1)
        return jnp.sum(w_sm * stacked, axis=-1).astype(inputs[0].dtype)

    # Case 1: module-default init (weights = 1/n_views), small lane-dense shape.
    n_views, B, D = 3, 8, 256
    keys = jax.random.split(key, n_views + 1)
    inputs = [jax.random.normal(k, (B, D), dtype=jnp.float32) for k in keys[:n_views]]
    weights = jnp.full((n_views,), 1.0 / n_views, dtype=jnp.float32)
    out = jax.block_until_ready(weighted_mean(inputs, weights))
    assert out.shape == (B, D)
    assert jnp.allclose(out, ref_fn(inputs, weights), atol=1e-5, rtol=1e-5)

    # Case 2: small VMEM budget forces the tiled cdiv grid with a masked remainder in D.
    B2, D2 = 24, 384
    keys2 = jax.random.split(keys[-1], n_views + 1)
    inputs2 = [jax.random.normal(k, (B2, D2), dtype=jnp.float32) for k in keys2[:n_views]]
    weights2 = jax.random.normal(keys2[-1], (n_views,), dtype=jnp.float32) * 0.5
    out2 = jax.block_until_ready(
        weighted_mean(inputs2, weights2, tile_budget_bytes=64 * 1024))
    assert out2.shape == (B2, D2)
    assert jnp.allclose(out2, ref_fn(inputs2, weights2), atol=1e-5, rtol=1e-5)

    # Case 3: D not a multiple of 128 -> wrapper reshapes views to a lane-dense slab.
    B3, D3 = 16, 96
    keys3 = jax.random.split(keys2[-1], n_views + 1)
    inputs3 = [jax.random.normal(k, (B3, D3), dtype=jnp.float32) for k in keys3[:n_views]]
    weights3 = jax.random.normal(keys3[-1], (n_views,), dtype=jnp.float32)
    out3 = jax.block_until_ready(weighted_mean(inputs3, weights3))
    assert out3.shape == (B3, D3)
    assert jnp.allclose(out3, ref_fn(inputs3, weights3), atol=1e-5, rtol=1e-5)

    # Case 4: awkward total size (not divisible by 128) -> full-extent block fallback.
    B4, D4 = 2, 50
    keys4 = jax.random.split(keys3[-1], n_views + 1)
    inputs4 = [jax.random.normal(k, (B4, D4), dtype=jnp.float32) for k in keys4[:n_views]]
    weights4 = jax.random.normal(keys4[-1], (n_views,), dtype=jnp.float32)
    out4 = jax.block_until_ready(weighted_mean(inputs4, weights4))
    assert out4.shape == (B4, D4)
    assert jnp.allclose(out4, ref_fn(inputs4, weights4), atol=1e-5, rtol=1e-5)

    print("KERNEL_OK")
</pallas_src>

<mosaic_0001>
module attributes {stable_mosaic.version = 11 : i64} {
  func.func @_weighted_mean_kernel(%arg0: i32, %arg1: i32, %arg2: memref<3xf32, #tpu.memory_space<smem>>, %arg3: memref<8x256xf32, #tpu.memory_space<vmem>>, %arg4: memref<8x256xf32, #tpu.memory_space<vmem>>, %arg5: memref<8x256xf32, #tpu.memory_space<vmem>>, %arg6: memref<8x256xf32, #tpu.memory_space<vmem>>) attributes {dimension_semantics = [#tpu.dimension_semantics<parallel>, #tpu.dimension_semantics<parallel>], iteration_bounds = array<i64: 1, 1>, scalar_prefetch = 0 : i64, scratch_operands = 0 : i64, tpu.core_type = #tpu.core_type<tc>, window_params = [{transform_indices = @transform_0, window_bounds = array<i64: 3>}, {transform_indices = @transform_1, window_bounds = array<i64: 8, 256>}, {transform_indices = @transform_2, window_bounds = array<i64: 8, 256>}, {transform_indices = @transform_3, window_bounds = array<i64: 8, 256>}, {transform_indices = @transform_4, window_bounds = array<i64: 8, 256>}]} {
    %c0 = arith.constant 0 : index
    %c0_0 = arith.constant 0 : index
    %0 = vector.load %arg3[%c0, %c0_0] : memref<8x256xf32, #tpu.memory_space<vmem>>, vector<8x256xf32>
    %c0_1 = arith.constant 0 : index
    %1 = memref.load %arg2[%c0_1] : memref<3xf32, #tpu.memory_space<smem>>
    %2 = vector.broadcast %1 : f32 to vector<8x256xf32>
    %3 = arith.mulf %0, %2 : vector<8x256xf32>
    %c0_2 = arith.constant 0 : index
    %c0_3 = arith.constant 0 : index
    %4 = vector.load %arg4[%c0_2, %c0_3] : memref<8x256xf32, #tpu.memory_space<vmem>>, vector<8x256xf32>
    %c1 = arith.constant 1 : index
    %5 = memref.load %arg2[%c1] : memref<3xf32, #tpu.memory_space<smem>>
    %6 = vector.broadcast %5 : f32 to vector<8x256xf32>
    %7 = arith.mulf %4, %6 : vector<8x256xf32>
    %8 = arith.addf %3, %7 : vector<8x256xf32>
    %c0_4 = arith.constant 0 : index
    %c0_5 = arith.constant 0 : index
    %9 = vector.load %arg5[%c0_4, %c0_5] : memref<8x256xf32, #tpu.memory_space<vmem>>, vector<8x256xf32>
    %c2 = arith.constant 2 : index
    %10 = memref.load %arg2[%c2] : memref<3xf32, #tpu.memory_space<smem>>
    %11 = vector.broadcast %10 : f32 to vector<8x256xf32>
    %12 = arith.mulf %9, %11 : vector<8x256xf32>
    %13 = arith.addf %8, %12 : vector<8x256xf32>
    %c0_6 = arith.constant 0 : index
    %c0_7 = arith.constant 0 : index
    %14 = vector.load %arg6[%c0_6, %c0_7] : memref<8x256xf32, #tpu.memory_space<vmem>>, vector<8x256xf32>
    tpu.vector_store %arg6[%c0_6, %c0_7], %13 {strides = array<i32>} : memref<8x256xf32, #tpu.memory_space<vmem>>, vector<8x256xf32>,
    return
  }
  func.func @transform_0(%arg0: i32, %arg1: i32) -> i32 {
    %c0_i32 = arith.constant 0 : i32
    %c0_i32_0 = arith.constant 0 : i32
    return %c0_i32 : i32
  }
  func.func @transform_1(%arg0: i32, %arg1: i32) -> (i32, i32) {
    %c0_i32 = arith.constant 0 : i32
    return %arg0, %arg1 : i32, i32
  }
  func.func @transform_2(%arg0: i32, %arg1: i32) -> (i32, i32) {
    %c0_i32 = arith.constant 0 : i32
    return %arg0, %arg1 : i32, i32
  }
  func.func @transform_3(%arg0: i32, %arg1: i32) -> (i32, i32) {
    %c0_i32 = arith.constant 0 : i32
    return %arg0, %arg1 : i32, i32
  }
  func.func @transform_4(%arg0: i32, %arg1: i32) -> (i32, i32) {
    %c0_i32 = arith.constant 0 : i32
    return %arg0, %arg1 : i32, i32
  }
}

</mosaic_0001>

<bundles_post_ra>
// kernel: tpu_custom_call.1
= control target key start
LH: loop header
LB: loop body
LE: loop exit
PB: predicated region body
PF: predicated region fallthrough
CT: control target
= control target key end

     0   :  { %9 = vsyncpa [#allocation5], 0  ;;  %s308_s0 = inlined_call_operand.hbm [shape: f32[3], index: 0, kind: input, shape index: {}]   ;;  %s309_s1 = inlined_call_operand.hbm [shape: f32[8,256], index: 1, kind: input, shape index: {}]   ;;  %s310_s2 = inlined_call_operand.hbm [shape: f32[8,256], index: 2, kind: input, shape index: {}]   ;;  %s311_s3 = inlined_call_operand.hbm [shape: f32[8,256], index: 3, kind: input, shape index: {}]   ;;  %s312_s4 = inlined_call_operand.hbm [shape: f32[8,256], index: 4, kind: output, shape index: {}]  }
   0x1   :  { %10 = vsyncpa [#allocation3], 0 }
   0x2   :  { %11 = vsyncpa [#allocation8], 0 }
   0x3   :  { %12 = vsyncpa [#allocation4], 0  ;;  %s218_s15 = smov [#allocation7]   ;;  %s219_s17 = smov [#allocation6]  }
   0x4   :  { %s37_s16 = sshll.u32 %s218_s15, 4  ;;  %s27_s18 = sshll.u32 %s219_s17, 4  ;;  %s38_s16 = int_to_ptr.vmem [resolvable:$true] %s37_s16  ;;  %s28_s18 = int_to_ptr.vmem [resolvable:$true] %s27_s18 }
   0x5   :  { %s112_s21 = scalar_lea.hbm %s310_s2, 256 }
   0x6   :  { %p113_p0 = scmp.ne.s32.totalorder %s310_s2, %s112_s21  ;;  %p116_p1 = scmp.lt.u32.totalorder %s112_s21, %s310_s2 }
   0x8   :  { %p118_p2 = pnand %p116_p1, %p113_p0 }
   0xa   :  { %121 = shalt.err (!%p118_p2)
}
   0xb   :  { %s122_s26 = scalar_lea.vmem %s38_s16, 256  ;;  %p127_p4 = scmp.lt.s32.totalorder %s38_s16, %s38_s16 }
   0xc   :  { %p123_p3 = scmp.ne.s32.totalorder %s38_s16, %s122_s26  ;;  %p128_p5 = scmp.lt.s32.totalorder %s122_s26, %s122_s26 }
   0xe   :  { %p129_p6 = por %p128_p5, %p127_p4 }
  0x10   :  { %p130_p7 = pnand %p129_p6, %p123_p3 }
  0x12   :  { %133 = shalt.err (!%p130_p7)
}
  0x13   :  { %40 = dma.hbm_to_vmem [thread:$0]  %s310_s2, 256, %s38_s16, [#allocation8]  }
  0x14   :  { %s134_s5 = scalar_lea.hbm %s308_s0, 16 }
  0x15   :  { %p135_p8 = scmp.ne.s32.totalorder %s308_s0, %s134_s5  ;;  %p138_p9 = scmp.lt.u32.totalorder %s134_s5, %s308_s0 }
  0x17   :  { %p140_p10 = pnand %p138_p9, %p135_p8 }
  0x19   :  { %143 = shalt.err (!%p140_p10)
}
  0x1a   :  { %s220_s10 = smov [#allocation2]   ;;  %s144_s14 = scalar_lea.hbm %s309_s1, 256 }
  0x1b   :  { %20 = dma.hbm_to_smem %s308_s0, 16, %s220_s10, [#allocation5]  }
  0x1c   :  { %p145_p11 = scmp.ne.s32.totalorder %s309_s1, %s144_s14  ;;  %p148_p12 = scmp.lt.u32.totalorder %s144_s14, %s309_s1 }
  0x1e   :  { %p150_p13 = pnand %p148_p12, %p145_p11 }
  0x20   :  { %153 = shalt.err (!%p150_p13)
}
  0x21   :  { %s154_s20 = scalar_lea.vmem %s28_s18, 256  ;;  %p159_p1 = scmp.lt.s32.totalorder %s28_s18, %s28_s18 }
  0x22   :  { %p155_p0 = scmp.ne.s32.totalorder %s28_s18, %s154_s20  ;;  %p160_p2 = scmp.lt.s32.totalorder %s154_s20, %s154_s20 }
  0x24   :  { %p161_p3 = por %p160_p2, %p159_p1 }
  0x26   :  { %p162_p4 = pnand %p161_p3, %p155_p0 }
  0x28   :  { %165 = shalt.err (!%p162_p4)
}
  0x29   :  { %30 = dma.hbm_to_vmem [thread:$0]  %s309_s1, 256, %s28_s18, [#allocation3]  }
  0x2a   :  { %s221_s22 = smov [#allocation9]   ;;  %s166_s26 = scalar_lea.hbm %s311_s3, 256 }
  0x2b   :  { %s47_s23 = sshll.u32 %s221_s22, 4  ;;  %p167_p5 = scmp.ne.s32.totalorder %s311_s3, %s166_s26  ;;  %s48_s23 = int_to_ptr.vmem [resolvable:$true] %s47_s23 }
  0x2c   :  { %p170_p6 = scmp.lt.u32.totalorder %s166_s26, %s311_s3 }
  0x2e   :  { %p172_p7 = pnand %p170_p6, %p167_p5 }
  0x30   :  { %175 = shalt.err (!%p172_p7)
}
  0x31   :  { %s176_s5 = scalar_lea.vmem %s48_s23, 256  ;;  %p181_p9 = scmp.lt.s32.totalorder %s48_s23, %s48_s23 }
  0x32   :  { %p177_p8 = scmp.ne.s32.totalorder %s48_s23, %s176_s5  ;;  %p182_p10 = scmp.lt.s32.totalorder %s176_s5, %s176_s5 }
  0x34   :  { %p183_p11 = por %p182_p10, %p181_p9 }
  0x36   :  { %p184_p12 = pnand %p183_p11, %p177_p8 }
  0x38   :  { %187 = shalt.err (!%p184_p12)
}
  0x39   :  { %50 = dma.hbm_to_vmem [thread:$0]  %s311_s3, 256, %s48_s23, [#allocation8]  }
  0x3a   :  { %210 = dma.done.wait [#allocation5], 16  }
  0x3b   :  { %211 = vsyncadd [#allocation5], 4294967280 }
  0x3c   :  { %212 = dma.done.wait [#allocation3], 256  }
  0x3d   :  { %213 = vsyncadd [#allocation3], 4294967040 }
  0x3e   :  { %214 = dma.done.wait [#allocation8], 512  }
  0x3f   :  { %215 = vsyncadd [#allocation8], 4294966784 }
  0x40   :  { %63 = sfence }
  0x41   :  { %s66_s6 = sld [smem:[#allocation2]]  ;;  %s105_s7 = sld [smem:[#allocation2 + $0x1]]  ;;  %v64_v0 = vld [vmem:[#allocation6] sm:$0xff]  ;;  %v70_v1 = vld [vmem:[#allocation7] sm:$0xff]  ;;  %v65_v2 = vld [vmem:[#allocation6 + $0x8] sm:$0xff] }
  0x42   :  { %s106_s8 = sld [smem:[#allocation2 + $0x2]]  ;;  %v78_v3 = vld [vmem:[#allocation9] sm:$0xff]  ;;  %v71_v4 = vld [vmem:[#allocation7 + $0x8] sm:$0xff]  ;;  %v79_v5 = vld [vmem:[#allocation9 + $0x8] sm:$0xff]  ;;  %s222_s3 = smov [#allocation10]  }
  0x43   :  { %s94_s9 = sshll.u32 %s222_s3, 4  ;;  %s95_s9 = int_to_ptr.vmem [resolvable:$true] %s94_s9 }
  0x44   :  { %s188_s10 = scalar_lea.vmem %s95_s9, 256  ;;  %p193_p0 = scmp.lt.s32.totalorder %s95_s9, %s95_s9 }
  0x45   :  { %p189_p13 = scmp.ne.s32.totalorder %s95_s9, %s188_s10  ;;  %p194_p1 = scmp.lt.s32.totalorder %s188_s10, %s188_s10 }
  0x47   :  { %v67_v6 = vstv %s66_s6  ;;  %v73_v7 = vstv %s105_s7  ;;  %p195_p2 = por %p194_p1, %p193_p0 }
  0x48   :  { %v68_v8 = vmul.f32 %v67_v6, %v64_v0  ;;  %v74_v9 = vmul.f32 %v73_v7, %v70_v1  ;;  %v81_v10 = vstv %s106_s8  ;;  %v69_v11 = vmul.f32 %v67_v6, %v65_v2 }
  0x49   :  { %v82_v12 = vmul.f32 %v81_v10, %v78_v3  ;;  %v75_v13 = vmul.f32 %v73_v7, %v71_v4  ;;  %v83_v14 = vmul.f32 %v81_v10, %v79_v5  ;;  %p196_p3 = pnand %p195_p2, %p189_p13 }
  0x4a   :  { %v76_v15 = vadd.f32 %v74_v9, %v68_v8 }
  0x4b   :  { %v77_v16 = vadd.f32 %v75_v13, %v69_v11 }
  0x4c   :  { %v84_v17 = vadd.f32 %v82_v12, %v76_v15 }
  0x4d   :  { %v85_v18 = vadd.f32 %v83_v14, %v77_v16 }
  0x4e   :  { %86 = vst [vmem:[#allocation10] sm:$0xff] %v84_v17 }
  0x4f   :  { %87 = vst [vmem:[#allocation10 + $0x8] sm:$0xff] %v85_v18 }
  0x50   :  { %199 = shalt.err (!%p196_p3)
}
  0x51   :  { %s200_s2 = scalar_lea.hbm %s312_s4, 256 }
  0x52   :  { %p201_p4 = scmp.ne.s32.totalorder %s312_s4, %s200_s2  ;;  %p204_p5 = scmp.lt.u32.totalorder %s200_s2, %s312_s4 }
  0x54   :  { %p206_p6 = pnand %p204_p5, %p201_p4 }
  0x56   :  { %209 = shalt.err (!%p206_p6)
}
  0x57   :  { %97 = dma.vmem_to_hbm [thread:$0]  %s95_s9, 256, %s312_s4, [#allocation4]  }
  0x58   :  { %216 = dma.done.wait [#allocation4], 256  }
  0x59   :  { %217 = vsyncadd [#allocation4], 4294967040 }
  0x5a   :  { %101 = vsyncpa [#allocation3], 1 }
  0x5b   :  { %102 = vsyncpa [#allocation8], 1 }
  0x5c   :  { %103 = vsyncpa [#allocation4], 1 }
  0x5d   :  { %104 = vsyncpa [#allocation5], 1 }

</bundles_post_ra>
